<compile_context>
chip_gen: v7x
topology: tpu7x:2x2x1
jax: 0.10.0
libtpu: 0.0.40
codegen_flags: <defaults>
</compile_context>

<pallas_src>
import functools

import jax
import jax.numpy as jnp
import numpy as np
from jax.experimental import pallas as pl
from jax.experimental.pallas import tpu as pltpu


def _round_up(x, m):
    return ((x + m - 1) // m) * m


def _cnn_char_kernel(x_ref, wf_ref, b_ref, mask_ref, o_ref, *,
                     seq_len, f_max, alphabet_size):
    """Fused (embedding ∘ conv) + global max-pool + bias + ReLU.

    x_ref:    (tb, Lp)          int32  char ids, Lp = seq_len + f_max - 1 (padded)
    wf_ref:   (f_max*A, Cp)     bf16   table-fused, tap-major conv weights
                                       Wf[k*A + a, c] = (table @ w_k)[a, c]
    b_ref:    (1, Cp)           f32    concatenated conv biases (zero pad cols)
    mask_ref: (seq_len, Cp)     f32    0 where time position is valid for the
                                       column's filter size, -1e30 otherwise
    o_ref:    (tb, Cp)          f32
    """
    tb, _ = x_ref.shape
    KK, Cp = wf_ref.shape                 # KK = f_max * A
    L = seq_len
    A = alphabet_size
    in_dtype = wf_ref.dtype

    ids = x_ref[...]                      # (tb, Lp) int32

    # ---- Shifted one-hot im2col, built directly in the matmul dtype ----
    # X[b, t, k*A + a] = 1  iff  ids[b, t+k] == a
    # Encode code_k = k*A + ids[:, k:k+L]; per row each tap lights exactly one
    # lane inside its own disjoint A-wide block, so OR over taps is exact.
    iota_j = jax.lax.broadcasted_iota(jnp.int32, (1, 1, KK), 2)
    x_hot = None
    for k in range(f_max):                # static, short loop
        code_k = ids[:, k:k + L] + k * A                     # (tb, L) lane slice
        term = (code_k[:, :, None] == iota_j)                # (tb, L, KK) bool
        x_hot = term if x_hot is None else jnp.logical_or(x_hot, term)
    x2 = x_hot.astype(in_dtype).reshape(tb * L, KK)          # cheap leading merge

    # ---- ONE fat-K, lane-dense MXU matmul: M = tb*L, K = f_max*A, N = Cp ----
    conv = jnp.dot(x2, wf_ref[...], preferred_element_type=jnp.float32)
    conv = conv.reshape(tb, L, Cp)

    # Knock out conv positions that don't exist for a column's filter size,
    # then global max-pool over time.
    conv = conv + mask_ref[...]                              # (L, Cp) broadcasts
    pooled = jnp.max(conv, axis=1)                           # (tb, Cp)

    # Bias + ReLU folded AFTER the max-pool (monotone => identical result).
    o_ref[...] = jnp.maximum(pooled + b_ref[...], 0.0)


def cnn_char_fused(x, wf, b_all, mask, *, seq_len, f_max, alphabet_size,
                   block_b=256):
    """x: (B, L) int32 char ids -> (B_padded, C_padded) f32."""
    B, L = x.shape
    assert L == seq_len and L >= f_max
    KK, Cp = wf.shape
    Lp = seq_len + f_max - 1

    # Pad the sequence so every tap-shifted slice has the same static length;
    # padded positions only ever feed masked-out (invalid) output rows.
    x = jnp.pad(x.astype(jnp.int32), ((0, 0), (0, Lp - L)))

    # Batch tile: big enough to amortize the ~0.35us grid-step overhead and to
    # give the matmul M = tb*L >= 128, but clamped for tiny batches.
    tb = min(block_b, _round_up(B, 8))
    Bp = _round_up(B, tb)
    if Bp != B:
        x = jnp.pad(x, ((0, Bp - B), (0, 0)))

    out = pl.pallas_call(
        functools.partial(_cnn_char_kernel, seq_len=seq_len, f_max=f_max,
                          alphabet_size=alphabet_size),
        out_shape=jax.ShapeDtypeStruct((Bp, Cp), jnp.float32),
        grid_spec=pltpu.PrefetchScalarGridSpec(
            num_scalar_prefetch=0,
            grid=(Bp // tb,),
            in_specs=[
                pl.BlockSpec((tb, Lp), lambda i: (i, 0)),        # char ids
                pl.BlockSpec((KK, Cp), lambda i: (0, 0)),        # fused weights
                pl.BlockSpec((1, Cp), lambda i: (0, 0)),         # biases
                pl.BlockSpec((seq_len, Cp), lambda i: (0, 0)),   # validity mask
            ],
            out_specs=pl.BlockSpec((tb, Cp), lambda i: (i, 0)),  # lane-dense out
        ),
        compiler_params=pltpu.CompilerParams(
            dimension_semantics=("parallel",)),   # batch shards across TCs
    )(x, wf, b_all, mask)
    return out


def init_params(key, alphabet_size, embed_dim, num_filters, filter_sizes):
    """Deterministic synthetic parameters (shapes match the torch module)."""
    keys = jax.random.split(key, 1 + 2 * len(filter_sizes))
    params = {
        # nn.Embedding(alphabet_size, embed_dim).weight
        "embedding": 0.1 * jax.random.normal(
            keys[0], (alphabet_size, embed_dim), jnp.float32),
        "convs": [],
    }
    for i, f in enumerate(filter_sizes):
        # torch Conv2d weight is (F, 1, f, E); stored tap-major as (f, E, F).
        w = 0.1 * jax.random.normal(
            keys[1 + 2 * i], (f, embed_dim, num_filters), jnp.float32)
        b = 0.1 * jax.random.normal(
            keys[2 + 2 * i], (1, num_filters), jnp.float32)
        params["convs"].append((w, b))
    return params


def pack_params(params, filter_sizes, seq_len, *, compute_dtype=jnp.bfloat16,
                lane_multiple=128):
    """Pack once at init (hoisted out of the forward) into the fused layout.

    Pre-fuses the embedding table into the conv weights and zero-pads the
    channel dim to a multiple of 128 lanes.
    """
    table = np.asarray(params["embedding"], np.float32)      # (A, E)
    A, _ = table.shape
    F = np.asarray(params["convs"][0][0]).shape[-1]
    n_sizes = len(filter_sizes)
    f_max = max(filter_sizes)
    C = F * n_sizes
    Cp = _round_up(C, lane_multiple)

    wf = np.zeros((f_max * A, Cp), np.float32)
    b_all = np.zeros((1, Cp), np.float32)
    mask = np.zeros((seq_len, Cp), np.float32)
    for s, ((w, b), f) in enumerate(zip(params["convs"], filter_sizes)):
        w = np.asarray(w, np.float32)                        # (f, E, F)
        cols = slice(s * F, (s + 1) * F)
        for k in range(f):
            # Fuse the embedding lookup into the conv: (A,E) @ (E,F) -> (A,F).
            wf[k * A:(k + 1) * A, cols] = table @ w[k]
        b_all[:, cols] = np.asarray(b, np.float32)
        # conv positions t >= L - f + 1 do not exist for this filter size.
        mask[seq_len - f + 1:, cols] = -1e30

    return {
        "wf": jnp.asarray(wf, compute_dtype),     # bf16 MXU operand (f32 acc)
        "bias": jnp.asarray(b_all),               # f32, added post-matmul
        "mask": jnp.asarray(mask),                # f32, added post-matmul
        "seq_len": seq_len,
        "f_max": f_max,
        "alphabet_size": A,
        "num_features": C,
    }


def cnn_character_level_forward(packed, x, *, block_b=256):
    """x: (B, L) int32 indices -> (B, num_filters * len(filter_sizes)) f32."""
    out = cnn_char_fused(
        x, packed["wf"], packed["bias"], packed["mask"],
        seq_len=packed["seq_len"], f_max=packed["f_max"],
        alphabet_size=packed["alphabet_size"], block_b=block_b)
    # nn.Dropout(0.5) is identity in eval mode.
    # TODO(synk): training-mode dropout (0.5 Bernoulli mask + 2x scale) not applied.
    return out[:x.shape[0], :packed["num_features"]]


def _reference_forward(params, x, filter_sizes):
    """Plain-JAX f32 reference mirroring the torch math (correctness check)."""
    emb = jnp.take(params["embedding"], x, axis=0)           # (B, L, E)
    L = x.shape[1]
    feats = []
    for (w, b), f in zip(params["convs"], filter_sizes):
        T = L - f + 1
        conv = b.reshape(1, 1, -1)
        for k in range(f):
            conv = conv + jnp.einsum("ble,ef->blf", emb[:, k:k + T, :], w[k],
                                     precision=jax.lax.Precision.HIGHEST)
        feats.append(jnp.max(jax.nn.relu(conv), axis=1))
    return jnp.concatenate(feats, axis=1)


if __name__ == "__main__":
    # Small shapes consistent with the module.
    alphabet_size = 32
    embed_dim = 32
    num_filters = 8
    filter_sizes = (3, 4, 5)
    B, L = 2, 16

    key = jax.random.PRNGKey(0)
    k_params, k_x = jax.random.split(key)
    params = init_params(k_params, alphabet_size, embed_dim, num_filters,
                         filter_sizes)
    x = jax.random.randint(k_x, (B, L), 0, alphabet_size, dtype=jnp.int32)

    # Pack ONCE (host packing + H2D transfer hoisted out of the forward).
    packed = pack_params(params, filter_sizes, seq_len=L)

    out = cnn_character_level_forward(packed, x)
    out = jax.block_until_ready(out)
    assert out.shape == (B, num_filters * len(filter_sizes)), out.shape

    ref = jax.block_until_ready(_reference_forward(params, x, filter_sizes))
    # Tolerance accounts for bf16 rounding of the table-fused weights
    # (one-hot operand is exact in bf16; accumulation is f32).
    assert jnp.allclose(out, ref, atol=5e-3, rtol=5e-3), \
        float(jnp.max(jnp.abs(out - ref)))

    print("KERNEL_OK")
</pallas_src>

<mosaic_0001>
module attributes {stable_mosaic.version = 11 : i64} {
  func.func @_cnn_char_kernel(%arg0: i32, %arg1: memref<8x20xi32, #tpu.memory_space<vmem>>, %arg2: memref<160x128xbf16, #tpu.memory_space<vmem>>, %arg3: memref<1x128xf32, #tpu.memory_space<vmem>>, %arg4: memref<16x128xf32, #tpu.memory_space<vmem>>, %arg5: memref<8x128xf32, #tpu.memory_space<vmem>>) attributes {dimension_semantics = [#tpu.dimension_semantics<parallel>], iteration_bounds = array<i64: 1>, scalar_prefetch = 0 : i64, scratch_operands = 0 : i64, tpu.core_type = #tpu.core_type<tc>, window_params = [{transform_indices = @transform_0, window_bounds = array<i64: 8, 20>}, {pipeline_mode = #tpu.pipeline_mode<synchronous>, transform_indices = @transform_1, window_bounds = array<i64: 160, 128>}, {pipeline_mode = #tpu.pipeline_mode<synchronous>, transform_indices = @transform_2, window_bounds = array<i64: 1, 128>}, {pipeline_mode = #tpu.pipeline_mode<synchronous>, transform_indices = @transform_3, window_bounds = array<i64: 16, 128>}, {transform_indices = @transform_4, window_bounds = array<i64: 8, 128>}]} {
    %c0 = arith.constant 0 : index
    %c0_0 = arith.constant 0 : index
    %0 = vector.load %arg1[%c0, %c0_0] : memref<8x20xi32, #tpu.memory_space<vmem>>, vector<8x20xi32>
    %1 = tpu.iota {dimensions = array<i32: 2>} : vector<1x1x160xi32>
    %2 = vector.extract_strided_slice %0 {offsets = [0, 0], sizes = [8, 16], strides = [1, 1]} : vector<8x20xi32> to vector<8x16xi32>
    %c0_i32 = arith.constant 0 : i32
    %3 = vector.broadcast %c0_i32 : i32 to vector<8x16xi32>
    %4 = arith.addi %2, %3 : vector<8x16xi32>
    %5 = vector.shape_cast %4 : vector<8x16xi32> to vector<8x16x1xi32>
    %6 = vector.broadcast %5 : vector<8x16x1xi32> to vector<8x16x160xi32>
    %7 = vector.broadcast %1 : vector<1x1x160xi32> to vector<8x16x160xi32>
    %8 = arith.cmpi eq, %6, %7 : vector<8x16x160xi32>
    %9 = vector.extract_strided_slice %0 {offsets = [0, 1], sizes = [8, 16], strides = [1, 1]} : vector<8x20xi32> to vector<8x16xi32>
    %c32_i32 = arith.constant 32 : i32
    %10 = vector.broadcast %c32_i32 : i32 to vector<8x16xi32>
    %11 = arith.addi %9, %10 : vector<8x16xi32>
    %12 = vector.shape_cast %11 : vector<8x16xi32> to vector<8x16x1xi32>
    %13 = vector.broadcast %12 : vector<8x16x1xi32> to vector<8x16x160xi32>
    %14 = vector.broadcast %1 : vector<1x1x160xi32> to vector<8x16x160xi32>
    %15 = arith.cmpi eq, %13, %14 : vector<8x16x160xi32>
    %16 = arith.ori %8, %15 : vector<8x16x160xi1>
    %17 = vector.extract_strided_slice %0 {offsets = [0, 2], sizes = [8, 16], strides = [1, 1]} : vector<8x20xi32> to vector<8x16xi32>
    %c64_i32 = arith.constant 64 : i32
    %18 = vector.broadcast %c64_i32 : i32 to vector<8x16xi32>
    %19 = arith.addi %17, %18 : vector<8x16xi32>
    %20 = vector.shape_cast %19 : vector<8x16xi32> to vector<8x16x1xi32>
    %21 = vector.broadcast %20 : vector<8x16x1xi32> to vector<8x16x160xi32>
    %22 = vector.broadcast %1 : vector<1x1x160xi32> to vector<8x16x160xi32>
    %23 = arith.cmpi eq, %21, %22 : vector<8x16x160xi32>
    %24 = arith.ori %16, %23 : vector<8x16x160xi1>
    %25 = vector.extract_strided_slice %0 {offsets = [0, 3], sizes = [8, 16], strides = [1, 1]} : vector<8x20xi32> to vector<8x16xi32>
    %c96_i32 = arith.constant 96 : i32
    %26 = vector.broadcast %c96_i32 : i32 to vector<8x16xi32>
    %27 = arith.addi %25, %26 : vector<8x16xi32>
    %28 = vector.shape_cast %27 : vector<8x16xi32> to vector<8x16x1xi32>
    %29 = vector.broadcast %28 : vector<8x16x1xi32> to vector<8x16x160xi32>
    %30 = vector.broadcast %1 : vector<1x1x160xi32> to vector<8x16x160xi32>
    %31 = arith.cmpi eq, %29, %30 : vector<8x16x160xi32>
    %32 = arith.ori %24, %31 : vector<8x16x160xi1>
    %33 = vector.extract_strided_slice %0 {offsets = [0, 4], sizes = [8, 16], strides = [1, 1]} : vector<8x20xi32> to vector<8x16xi32>
    %c128_i32 = arith.constant 128 : i32
    %34 = vector.broadcast %c128_i32 : i32 to vector<8x16xi32>
    %35 = arith.addi %33, %34 : vector<8x16xi32>
    %36 = vector.shape_cast %35 : vector<8x16xi32> to vector<8x16x1xi32>
    %37 = vector.broadcast %36 : vector<8x16x1xi32> to vector<8x16x160xi32>
    %38 = vector.broadcast %1 : vector<1x1x160xi32> to vector<8x16x160xi32>
    %39 = arith.cmpi eq, %37, %38 : vector<8x16x160xi32>
    %40 = arith.ori %32, %39 : vector<8x16x160xi1>
    %41 = arith.extui %40 : vector<8x16x160xi1> to vector<8x16x160xi32>
    %42 = arith.sitofp %41 : vector<8x16x160xi32> to vector<8x16x160xf32>
    %43 = arith.truncf %42 : vector<8x16x160xf32> to vector<8x16x160xbf16>
    %44 = vector.shape_cast %43 : vector<8x16x160xbf16> to vector<128x160xbf16>
    %c0_1 = arith.constant 0 : index
    %c0_2 = arith.constant 0 : index
    %45 = vector.load %arg2[%c0_1, %c0_2] : memref<160x128xbf16, #tpu.memory_space<vmem>>, vector<160x128xbf16>
    %cst = arith.constant dense<0.000000e+00> : vector<128x128xf32>
    %46 = tpu.matmul %44, %45, %cst {dimension_numbers = #tpu.dot_dimension_numbers<[1], [0], [0], [1], [0, 0, 1, 1], [], []>} : vector<128x160xbf16>, vector<160x128xbf16>, vector<128x128xf32> -> vector<128x128xf32>
    %47 = vector.shape_cast %46 : vector<128x128xf32> to vector<8x16x128xf32>
    %c0_3 = arith.constant 0 : index
    %c0_4 = arith.constant 0 : index
    %48 = vector.load %arg4[%c0_3, %c0_4] : memref<16x128xf32, #tpu.memory_space<vmem>>, vector<16x128xf32>
    %49 = vector.shape_cast %48 : vector<16x128xf32> to vector<1x16x128xf32>
    %50 = vector.broadcast %49 : vector<1x16x128xf32> to vector<8x16x128xf32>
    %51 = arith.addf %47, %50 : vector<8x16x128xf32>
    %cst_5 = arith.constant dense<0xFF800000> : vector<8x128xf32>
    %52 = vector.multi_reduction <maximumf>, %51, %cst_5 [1] : vector<8x16x128xf32> to vector<8x128xf32>
    %c0_6 = arith.constant 0 : index
    %c0_7 = arith.constant 0 : index
    %53 = vector.load %arg3[%c0_6, %c0_7] : memref<1x128xf32, #tpu.memory_space<vmem>>, vector<1x128xf32>
    %54 = vector.broadcast %53 : vector<1x128xf32> to vector<8x128xf32>
    %55 = arith.addf %52, %54 : vector<8x128xf32>
    %cst_8 = arith.constant 0.000000e+00 : f32
    %56 = vector.broadcast %cst_8 : f32 to vector<8x128xf32>
    %57 = arith.maximumf %55, %56 : vector<8x128xf32>
    %c0_9 = arith.constant 0 : index
    %c0_10 = arith.constant 0 : index
    %58 = vector.load %arg5[%c0_9, %c0_10] : memref<8x128xf32, #tpu.memory_space<vmem>>, vector<8x128xf32>
    tpu.vector_store %arg5[%c0_9, %c0_10], %57 {strides = array<i32>} : memref<8x128xf32, #tpu.memory_space<vmem>>, vector<8x128xf32>,
    return
  }
  func.func @transform_0(%arg0: i32) -> (i32, i32) {
    %c0_i32 = arith.constant 0 : i32
    %c0_i32_0 = arith.constant 0 : i32
    return %arg0, %c0_i32 : i32, i32
  }
  func.func @transform_1(%arg0: i32) -> (i32, i32) {
    %c0_i32 = arith.constant 0 : i32
    %c0_i32_0 = arith.constant 0 : i32
    %c0_i32_1 = arith.constant 0 : i32
    return %c0_i32, %c0_i32_0 : i32, i32
  }
  func.func @transform_2(%arg0: i32) -> (i32, i32) {
    %c0_i32 = arith.constant 0 : i32
    %c0_i32_0 = arith.constant 0 : i32
    %c0_i32_1 = arith.constant 0 : i32
    return %c0_i32, %c0_i32_0 : i32, i32
  }
  func.func @transform_3(%arg0: i32) -> (i32, i32) {
    %c0_i32 = arith.constant 0 : i32
    %c0_i32_0 = arith.constant 0 : i32
    %c0_i32_1 = arith.constant 0 : i32
    return %c0_i32, %c0_i32_0 : i32, i32
  }
  func.func @transform_4(%arg0: i32) -> (i32, i32) {
    %c0_i32 = arith.constant 0 : i32
    %c0_i32_0 = arith.constant 0 : i32
    return %arg0, %c0_i32 : i32, i32
  }
}

</mosaic_0001>

<bundles_post_ra>
// kernel: tpu_custom_call.1
= control target key start
LH: loop header
LB: loop body
LE: loop exit
PB: predicated region body
PF: predicated region fallthrough
CT: control target
= control target key end

     0   :  { %9 = vsyncpa [#allocation3], 0  ;;  %s1934_s0 = inlined_call_operand.hbm [shape: s32[8,20], index: 0, kind: input, shape index: {}]   ;;  %s1935_s1 = inlined_call_operand.hbm [shape: bf16[160,128], index: 1, kind: input, shape index: {}]   ;;  %s1936_s2 = inlined_call_operand.vmem [shape: f32[1,128], index: 2, kind: input, shape index: {}]   ;;  %s1937_s3 = inlined_call_operand.hbm [shape: f32[16,128], index: 3, kind: input, shape index: {}]   ;;  %s1938_s4 = inlined_call_operand.hbm [shape: f32[8,128], index: 4, kind: output, shape index: {}]  }
   0x1   :  { %10 = vsyncpa [#allocation6], 0 }
   0x2   :  { %11 = vsyncpa [#allocation4], 0  ;;  %s1437_s15 = smov [#allocation5]   ;;  %s1343_s19 = scalar_lea.hbm %s1935_s1, 1280 }
   0x3   :  { %s27_s16 = sshll.u32 %s1437_s15, 4  ;;  %p1344_p0 = scmp.ne.s32.totalorder %s1935_s1, %s1343_s19  ;;  %s28_s16 = int_to_ptr.vmem [resolvable:$true] %s27_s16 }
   0x4   :  { %p1347_p1 = scmp.lt.u32.totalorder %s1343_s19, %s1935_s1 }
   0x6   :  { %p1349_p2 = pnand %p1347_p1, %p1344_p0 }
   0x8   :  { %1352 = shalt.err (!%p1349_p2)
}
   0x9   :  { %s1353_s24 = scalar_lea.vmem %s28_s16, 1280  ;;  %p1358_p4 = scmp.lt.s32.totalorder %s28_s16, %s28_s16 }
   0xa   :  { %p1354_p3 = scmp.ne.s32.totalorder %s28_s16, %s1353_s24  ;;  %p1359_p5 = scmp.lt.s32.totalorder %s1353_s24, %s1353_s24 }
   0xc   :  { %p1360_p6 = por %p1359_p5, %p1358_p4 }
   0xe   :  { %p1361_p7 = pnand %p1360_p6, %p1354_p3 }
  0x10   :  { %1364 = shalt.err (!%p1361_p7)
}
  0x11   :  { %s1438_s25 = smov 64   ;;  %s1439_s26 = smov 4  }
  0x12   :  { %33 = dma.hbm_to_vmem [thread:$0]  %s1935_s1, 1280, %s28_s16, [#allocation6], %s1438_s25, %s1438_s25, %s1439_s26  }
  0x13   :  { %s1440_s29 = smov [#allocation2]   ;;  %s1441_s5 = smov [#allocation7]  }
  0x14   :  { %s18_s30 = sshll.u32 %s1440_s29, 4  ;;  %s41_s6 = sshll.u32 %s1441_s5, 4  ;;  %s19_s30 = int_to_ptr.vmem [resolvable:$true] %s18_s30  ;;  %s42_s6 = int_to_ptr.vmem [resolvable:$true] %s41_s6 }
  0x15   :  { %s1365_s9 = scalar_lea.hbm %s1934_s0, 128 }
  0x16   :  { %p1366_p8 = scmp.ne.s32.totalorder %s1934_s0, %s1365_s9  ;;  %p1369_p9 = scmp.lt.u32.totalorder %s1365_s9, %s1934_s0 }
  0x18   :  { %p1371_p10 = pnand %p1369_p9, %p1366_p8 }
  0x1a   :  { %1374 = shalt.err (!%p1371_p10)
}
  0x1b   :  { %s1375_s1 = scalar_lea.vmem %s19_s30, 128  ;;  %p1380_p12 = scmp.lt.s32.totalorder %s19_s30, %s19_s30 }
  0x1c   :  { %p1376_p11 = scmp.ne.s32.totalorder %s19_s30, %s1375_s1  ;;  %p1381_p13 = scmp.lt.s32.totalorder %s1375_s1, %s1375_s1 }
  0x1e   :  { %p1382_p0 = por %p1381_p13, %p1380_p12 }
  0x20   :  { %p1383_p1 = pnand %p1382_p0, %p1376_p11 }
  0x22   :  { %1386 = shalt.err (!%p1383_p1)
}
  0x23   :  { %21 = dma.hbm_to_vmem [thread:$0]  %s1934_s0, 128, %s19_s30, [#allocation3]  }
  0x24   :  { %s1387_s18 = scalar_lea.hbm %s1937_s3, 256 }
  0x25   :  { %p1388_p2 = scmp.ne.s32.totalorder %s1937_s3, %s1387_s18  ;;  %p1391_p3 = scmp.lt.u32.totalorder %s1387_s18, %s1937_s3 }
  0x27   :  { %p1393_p4 = pnand %p1391_p3, %p1388_p2 }
  0x29   :  { %1396 = shalt.err (!%p1393_p4)
}
  0x2a   :  { %s1397_s23 = scalar_lea.vmem %s42_s6, 256  ;;  %p1402_p6 = scmp.lt.s32.totalorder %s42_s6, %s42_s6 }
  0x2b   :  { %p1398_p5 = scmp.ne.s32.totalorder %s42_s6, %s1397_s23  ;;  %p1403_p7 = scmp.lt.s32.totalorder %s1397_s23, %s1397_s23 }
  0x2d   :  { %p1404_p8 = por %p1403_p7, %p1402_p6 }
  0x2f   :  { %p1405_p9 = pnand %p1404_p8, %p1398_p5 }
  0x31   :  { %1408 = shalt.err (!%p1405_p9)
}
  0x32   :  { %s1442_s0 = smov 128   ;;  %s1443_s24 = smov 8  }
  0x33   :  { %47 = dma.hbm_to_vmem [thread:$0]  %s1937_s3, 256, %s42_s6, [#allocation6], %s1442_s0, %s1442_s0, %s1443_s24  }
  0x34   :  { %1431 = dma.done.wait [#allocation3], 128  }
  0x35   :  { %1432 = vsyncadd [#allocation3], 4294967168 }
  0x36   :  { %1433 = dma.done.wait [#allocation6], 1536  }
  0x37   :  { %1434 = vsyncadd [#allocation6], 4294965760  ;;  %v59_v0 = vlaneseq  ;;  %v1444_v1 = vmov 0   ;;  %v1514_v4 = vld [vmem:[#allocation2] sm:$0xff]  ;;  %v1333_v7 = vld [vmem:[#allocation5] sm:$0xff]  }
  0x38   :  { %1011 = vmatprep.subr.bf16.mxu0 %v1444_v1  ;;  %1303 = vmatprep.subr.bf16.mxu1 %v1444_v1  ;;  %v1518_v6 = vadd.s32 32, %v1514_v4  ;;  %v1521_v8 = vadd.s32 64, %v1514_v4  ;;  %v1334_v12 = vld [vmem:[#allocation5 + $0x8] sm:$0xff]   ;;  %v1528_v14 = vadd.s32 96, %v1514_v4  ;;  %v1532_v16 = vadd.s32 128, %v1514_v4  ;;  %v1335_v24 = vld [vmem:[#allocation5 + $0x10] sm:$0xff]  }
  0x39   :  { %v1511_v2 = vshrl.u32 %v59_v0, 7  ;;  %1012 = vmatpush1.bf16.msra.mxu0 %v1333_v7  ;;  %1313 = vmatpush1.bf16.msra.mxu1 %v1333_v7  ;;  %v1336_v34 = vld [vmem:[#allocation5 + $0x18] sm:$0xff]   ;;  %v1337_v39 = vld [vmem:[#allocation5 + $0x20] sm:$0xff]   ;;  %v1338_v42 = vld [vmem:[#allocation5 + $0x28] sm:$0xff]  }
  0x3a   :  { %1013 = vmatprep.subr.bf16.mxu0 %v1444_v1  ;;  %1304 = vmatprep.subr.bf16.mxu1 %v1444_v1  ;;  %v1339_v45 = vld [vmem:[#allocation5 + $0x30] sm:$0xff]   ;;  %v1340_v48 = vld [vmem:[#allocation5 + $0x38] sm:$0xff]   ;;  %v1341_v51 = vld [vmem:[#allocation5 + $0x40] sm:$0xff]  }
  0x3b   :  { %v64_v3 = vsub.s32 0, %v1511_v2  ;;  %v86_v9 = vsub.s32 2, %v1511_v2  ;;  %v130_v11 = vsub.s32 6, %v1511_v2  ;;  %v97_v13 = vsub.s32 3, %v1511_v2  ;;  %v1342_v54 = vld [vmem:[#allocation5 + $0x48] sm:$0xff]  }
  0x3c   :  { %v141_v35 = vsub.s32 7, %v1511_v2  ;;  %v108_v38 = vsub.s32 4, %v1511_v2  ;;  %v75_v53 = vsub.s32 1, %v1511_v2  ;;  %v119_v60 = vsub.s32 5, %v1511_v2 }
  0x3d   :  { %v65_v5 = vrot.slane %v1514_v4, %v64_v3  ;;  %v186_v10 = vrot.slane %v1518_v6, %v64_v3  ;;  %v347_v15 = vrot.slane %v1521_v8, %v64_v3  ;;  %v1536_v17 = vrot.slane %v1514_v4, %v86_v9  ;;  %1014 = vmatpush1.bf16.msra.mxu0 %v1334_v12 }
  0x3e   :  { %v1539_v18 = vrot.slane %v1518_v6, %v86_v9  ;;  %v1542_v19 = vrot.slane %v1521_v8, %v86_v9  ;;  %v1545_v20 = vrot.slane %v1528_v14, %v86_v9  ;;  %v1548_v21 = vrot.slane %v1532_v16, %v86_v9  ;;  %1015 = vmatprep.subr.bf16.mxu0 %v1444_v1 }
  0x3f   :  { %67 = vbcast.lane.b32.xlu0 %v65_v5, 256  ;;  %189 = vbcast.lane.b32.xlu1 %v186_v10, 257  ;;  %v1551_v22 = vrot.slane %v1514_v4, %v130_v11  ;;  %v1554_v23 = vrot.slane %v1518_v6, %v130_v11  ;;  %v1557_v25 = vrot.slane %v1521_v8, %v130_v11 }
  0x40   :  { %v1561_v26 = vrot.slane %v1528_v14, %v130_v11  ;;  %v1564_v27 = vrot.slane %v1532_v16, %v130_v11  ;;  %v1567_v28 = vrot.slane %v1514_v4, %v97_v13  ;;  %v1570_v29 = vrot.slane %v1518_v6, %v97_v13  ;;  %1314 = vmatpush1.bf16.msra.mxu1 %v1334_v12 }
  0x41   :  { %v1573_v30 = vrot.slane %v1521_v8, %v97_v13  ;;  %v1576_v31 = vrot.slane %v1528_v14, %v97_v13  ;;  %v1579_v32 = vrot.slane %v1532_v16, %v97_v13  ;;  %v508_v33 = vrot.slane %v1528_v14, %v64_v3  ;;  %1016 = vmatpush1.bf16.msra.mxu0 %v1335_v24 }
  0x42   :  { %1017 = vmatprep.subr.bf16.mxu0 %v1444_v1  ;;  %v1586_v36 = vrot.slane %v1514_v4, %v141_v35  ;;  %v669_v37 = vrot.slane %v1532_v16, %v64_v3  ;;  %1305 = vmatprep.subr.bf16.mxu1 %v1444_v1  ;;  %v1593_v40 = vrot.slane %v1518_v6, %v141_v35  ;;  %v1649_v3 = vand.u32 127, %v59_v0 }
  0x43   :  { %71 = vbcast.lane.b32.xlu0 %v65_v5, 264  ;;  %193 = vbcast.lane.b32.xlu1 %v186_v10, 265  ;;  %v109_v41 = vrot.slane %v1514_v4, %v108_v38  ;;  %v1599_v43 = vrot.slane %v1521_v8, %v141_v35  ;;  %v234_v44 = vrot.slane %v1518_v6, %v108_v38 }
  0x44   :  { %1315 = vmatpush1.bf16.msra.mxu1 %v1335_v24  ;;  %v1605_v46 = vrot.slane %v1528_v14, %v141_v35  ;;  %v395_v47 = vrot.slane %v1521_v8, %v108_v38  ;;  %v1611_v49 = vrot.slane %v1532_v16, %v141_v35  ;;  %v556_v50 = vrot.slane %v1528_v14, %v108_v38 }
  0x45   :  { %1018 = vmatpush1.bf16.msra.mxu0 %v1336_v34  ;;  %1306 = vmatprep.subr.bf16.mxu1 %v1444_v1  ;;  %v717_v52 = vrot.slane %v1532_v16, %v108_v38  ;;  %v76_v55 = vrot.slane %v1514_v4, %v75_v53  ;;  %v198_v56 = vrot.slane %v1518_v6, %v75_v53 }
  0x46   :  { %1019 = vmatprep.subr.bf16.mxu0 %v1444_v1  ;;  %v359_v57 = vrot.slane %v1521_v8, %v75_v53  ;;  %v520_v58 = vrot.slane %v1528_v14, %v75_v53  ;;  %v681_v59 = vrot.slane %v1532_v16, %v75_v53  ;;  %v120_v61 = vrot.slane %v1514_v4, %v119_v60 }
  0x47   :  { %350 = vbcast.lane.b32.xlu0 %v347_v15, 258  ;;  %354 = vbcast.lane.b32.xlu1 %v347_v15, 266  ;;  %v246_v62 = vrot.slane %v1518_v6, %v119_v60  ;;  %v407_v63 = vrot.slane %v1521_v8, %v119_v60  ;;  %v729_v2 = vrot.slane %v1532_v16, %v119_v60  ;;  %v1655_v4 = vadd.s32 128, %v1649_v3 }
  0x48   :  { %1316 = vmatpush1.bf16.msra.mxu1 %v1336_v34  ;;  %v1445_v15 = vmov 0.0  }
  0x49   :  { %1020 = vmatpush1.bf16.msra.mxu0 %v1337_v39  ;;  %1307 = vmatprep.subr.bf16.mxu1 %v1444_v1 }
  0x4a   :  { %1021 = vmatprep.subr.bf16.mxu0 %v1444_v1 }
  0x4b   :  { %511 = vbcast.lane.b32.xlu0 %v508_v33, 259  ;;  %515 = vbcast.lane.b32.xlu1 %v508_v33, 267 }
  0x4c   :  { %1317 = vmatpush1.bf16.msra.mxu1 %v1337_v39 }
  0x4d   :  { %1022 = vmatpush1.bf16.msra.mxu0 %v1338_v42  ;;  %1308 = vmatprep.subr.bf16.mxu1 %v1444_v1 }
  0x4e   :  { %1023 = vmatprep.subr.bf16.mxu0 %v1444_v1 }
  0x4f   :  { %672 = vbcast.lane.b32.xlu0 %v669_v37, 260  ;;  %676 = vbcast.lane.b32.xlu1 %v669_v37, 268 }
  0x50   :  { %1318 = vmatpush1.bf16.msra.mxu1 %v1338_v42 }
  0x51   :  { %1024 = vmatpush1.bf16.msra.mxu0 %v1339_v45  ;;  %1309 = vmatprep.subr.bf16.mxu1 %v1444_v1 }
  0x52   :  { %1025 = vmatprep.subr.bf16.mxu0 %v1444_v1 }
  0x53   :  { %111 = vbcast.lane.b32.xlu0 %v109_v41, 256  ;;  %115 = vbcast.lane.b32.xlu1 %v109_v41, 264 }
  0x54   :  { %1319 = vmatpush1.bf16.msra.mxu1 %v1339_v45 }
  0x55   :  { %1026 = vmatpush1.bf16.msra.mxu0 %v1340_v48  ;;  %1310 = vmatprep.subr.bf16.mxu1 %v1444_v1 }
  0x56   :  { %1027 = vmatprep.subr.bf16.mxu0 %v1444_v1 }
  0x57   :  { %237 = vbcast.lane.b32.xlu0 %v234_v44, 257  ;;  %241 = vbcast.lane.b32.xlu1 %v234_v44, 265 }
  0x58   :  { %1320 = vmatpush1.bf16.msra.mxu1 %v1340_v48 }
  0x59   :  { %1028 = vmatpush1.bf16.msra.mxu0 %v1341_v51  ;;  %1311 = vmatprep.subr.bf16.mxu1 %v1444_v1 }
  0x5a   :  { %1029 = vmatprep.subr.bf16.mxu0 %v1444_v1 }
  0x5b   :  { %398 = vbcast.lane.b32.xlu0 %v395_v47, 258  ;;  %402 = vbcast.lane.b32.xlu1 %v395_v47, 266 }
  0x5c   :  { %1321 = vmatpush1.bf16.msra.mxu1 %v1341_v51 }
  0x5d   :  { %1030 = vmatpush1.bf16.msra.mxu0 %v1342_v54  ;;  %1312 = vmatprep.subr.bf16.mxu1 %v1444_v1  ;;  %v568_v1 = vrot.slane %v1528_v14, %v119_v60 }
  0x5f   :  { %559 = vbcast.lane.b32.xlu0 %v556_v50, 259  ;;  %563 = vbcast.lane.b32.xlu1 %v556_v50, 267 }
  0x60   :  { %1322 = vmatpush1.bf16.msra.mxu1 %v1342_v54 }
  0x63   :  { %720 = vbcast.lane.b32.xlu0 %v717_v52, 260  ;;  %724 = vbcast.lane.b32.xlu1 %v717_v52, 268 }
  0x67   :  { %78 = vbcast.lane.b32.xlu0 %v76_v55, 256  ;;  %82 = vbcast.lane.b32.xlu1 %v76_v55, 264 }
  0x6b   :  { %201 = vbcast.lane.b32.xlu0 %v198_v56, 257  ;;  %205 = vbcast.lane.b32.xlu1 %v198_v56, 265 }
  0x6f   :  { %362 = vbcast.lane.b32.xlu0 %v359_v57, 258  ;;  %366 = vbcast.lane.b32.xlu1 %v359_v57, 266 }
  0x73   :  { %523 = vbcast.lane.b32.xlu0 %v520_v58, 259  ;;  %527 = vbcast.lane.b32.xlu1 %v520_v58, 267 }
  0x77   :  { %684 = vbcast.lane.b32.xlu0 %v681_v59, 260  ;;  %688 = vbcast.lane.b32.xlu1 %v681_v59, 268 }
  0x7b   :  { %122 = vbcast.lane.b32.xlu0 %v120_v61, 256  ;;  %126 = vbcast.lane.b32.xlu1 %v120_v61, 264 }
  0x7f   :  { %249 = vbcast.lane.b32.xlu0 %v246_v62, 257  ;;  %253 = vbcast.lane.b32.xlu1 %v246_v62, 265 }
  0x83   :  { %410 = vbcast.lane.b32.xlu0 %v407_v63, 258  ;;  %414 = vbcast.lane.b32.xlu1 %v407_v63, 266 }
  0x87   :  { %571 = vbcast.lane.b32.xlu0 %v568_v1, 259  ;;  %575 = vbcast.lane.b32.xlu1 %v568_v1, 267 }
  0x8b   :  { %732 = vbcast.lane.b32.xlu0 %v729_v2, 260  ;;  %736 = vbcast.lane.b32.xlu1 %v729_v2, 268 }
  0x8f   :  { %89 = vbcast.lane.b32.xlu0 %v1536_v17, 256  ;;  %93 = vbcast.lane.b32.xlu1 %v1536_v17, 264 }
  0x93   :  { %213 = vbcast.lane.b32.xlu0 %v1539_v18, 257  ;;  %217 = vbcast.lane.b32.xlu1 %v1539_v18, 265 }
  0x97   :  { %374 = vbcast.lane.b32.xlu0 %v1542_v19, 258  ;;  %378 = vbcast.lane.b32.xlu1 %v1542_v19, 266 }
  0x9b   :  { %535 = vbcast.lane.b32.xlu0 %v1545_v20, 259  ;;  %539 = vbcast.lane.b32.xlu1 %v1545_v20, 267 }
  0x9f   :  { %696 = vbcast.lane.b32.xlu0 %v1548_v21, 260  ;;  %700 = vbcast.lane.b32.xlu1 %v1548_v21, 268 }
  0xa3   :  { %133 = vbcast.lane.b32.xlu0 %v1551_v22, 256  ;;  %137 = vbcast.lane.b32.xlu1 %v1551_v22, 264 }
  0xa7   :  { %261 = vbcast.lane.b32.xlu0 %v1554_v23, 257  ;;  %265 = vbcast.lane.b32.xlu1 %v1554_v23, 265 }
  0xab   :  { %422 = vbcast.lane.b32.xlu0 %v1557_v25, 258  ;;  %426 = vbcast.lane.b32.xlu1 %v1557_v25, 266 }
  0xaf   :  { %583 = vbcast.lane.b32.xlu0 %v1561_v26, 259  ;;  %587 = vbcast.lane.b32.xlu1 %v1561_v26, 267 }
  0xb1   :  { %v68_v5 = vpop.permute.xlu0 %67  ;;  %v190_v6 = vpop.permute.xlu1 %189 }
  0xb2   :  { %vm150_vm0 = vcmp.eq.s32.totalorder %v68_v5, %v1649_v3  ;;  %vm279_vm1 = vcmp.eq.s32.totalorder %v190_v6, %v1649_v3  ;;  %vm151_vm2 = vcmp.eq.s32.totalorder %v68_v5, %v1655_v4  ;;  %vm280_vm3 = vcmp.eq.s32.totalorder %v190_v6, %v1655_v4 }
  0xb3   :  { %744 = vbcast.lane.b32.xlu0 %v1564_v27, 260  ;;  %748 = vbcast.lane.b32.xlu1 %v1564_v27, 268  ;;  %vm311_vm5 = vmor %vm150_vm0, %vm279_vm1 }
  0xb4   :  { %vm312_vm7 = vmor %vm151_vm2, %vm280_vm3 }
  0xb5   :  { %v72_v0 = vpop.permute.xlu0 %71  ;;  %v194_v7 = vpop.permute.xlu1 %193 }
  0xb6   :  { %vm152_vm4 = vcmp.eq.s32.totalorder %v72_v0, %v1649_v3  ;;  %vm153_vm6 = vcmp.eq.s32.totalorder %v72_v0, %v1655_v4  ;;  %vm281_vm8 = vcmp.eq.s32.totalorder %v194_v7, %v1649_v3  ;;  %vm282_vm9 = vcmp.eq.s32.totalorder %v194_v7, %v1655_v4 }
  0xb7   :  { %100 = vbcast.lane.b32.xlu0 %v1567_v28, 256  ;;  %vm313_vm10 = vmor %vm152_vm4, %vm281_vm8  ;;  %104 = vbcast.lane.b32.xlu1 %v1567_v28, 264 }
  0xb8   :  { %vm314_vm11 = vmor %vm153_vm6, %vm282_vm9 }
  0xb9   :  { %v351_v8 = vpop.permute.xlu0 %350  ;;  %v355_v9 = vpop.permute.xlu1 %354 }
  0xba   :  { %vm440_vm12 = vcmp.eq.s32.totalorder %v351_v8, %v1649_v3  ;;  %vm441_vm13 = vcmp.eq.s32.totalorder %v351_v8, %v1655_v4  ;;  %vm442_vm0 = vcmp.eq.s32.totalorder %v355_v9, %v1649_v3  ;;  %vm443_vm1 = vcmp.eq.s32.totalorder %v355_v9, %v1655_v4 }
  0xbb   :  { %vm472_vm14 = vmor %vm311_vm5, %vm440_vm12  ;;  %225 = vbcast.lane.b32.xlu0 %v1570_v29, 257  ;;  %229 = vbcast.lane.b32.xlu1 %v1570_v29, 265 }
  0xbc   :  { %vm473_vm15 = vmor %vm312_vm7, %vm441_vm13 }
  0xbd   :  { %vm474_vm2 = vmor %vm313_vm10, %vm442_vm0  ;;  %v512_v10 = vpop.permute.xlu0 %511  ;;  %v516_v11 = vpop.permute.xlu1 %515 }
  0xbe   :  { %vm475_vm3 = vmor %vm314_vm11, %vm443_vm1  ;;  %vm601_vm4 = vcmp.eq.s32.totalorder %v512_v10, %v1649_v3  ;;  %vm602_vm6 = vcmp.eq.s32.totalorder %v512_v10, %v1655_v4  ;;  %vm603_vm7 = vcmp.eq.s32.totalorder %v516_v11, %v1649_v3  ;;  %vm604_vm9 = vcmp.eq.s32.totalorder %v516_v11, %v1655_v4 }
  0xbf   :  { %vm633_vm8 = vmor %vm472_vm14, %vm601_vm4  ;;  %386 = vbcast.lane.b32.xlu0 %v1573_v30, 258  ;;  %390 = vbcast.lane.b32.xlu1 %v1573_v30, 266 }
  0xc0   :  { %vm634_vm5 = vmor %vm473_vm15, %vm602_vm6 }
  0xc1   :  { %vm635_vm12 = vmor %vm474_vm2, %vm603_vm7  ;;  %v673_v12 = vpop.permute.xlu0 %672  ;;  %v677_v13 = vpop.permute.xlu1 %676 }
  0xc2   :  { %vm636_vm10 = vmor %vm475_vm3, %vm604_vm9  ;;  %vm762_vm11 = vcmp.eq.s32.totalorder %v673_v12, %v1649_v3  ;;  %vm763_vm13 = vcmp.eq.s32.totalorder %v673_v12, %v1655_v4  ;;  %vm764_vm15 = vcmp.eq.s32.totalorder %v677_v13, %v1649_v3  ;;  %vm765_vm1 = vcmp.eq.s32.totalorder %v677_v13, %v1655_v4 }
  0xc3   :  { %vm794_vm0 = vmor %vm633_vm8, %vm762_vm11  ;;  %547 = vbcast.lane.b32.xlu0 %v1576_v31, 259  ;;  %551 = vbcast.lane.b32.xlu1 %v1576_v31, 267  ;;  %vm1939_vm3 = vcmask 261120  }
  0xc4   :  { %vm795_vm14 = vmor %vm634_vm5, %vm763_vm13  ;;  %v1252_v16 = vsel %vm794_vm0, 1.0, %v1445_v15 }
  0xc5   :  { %vm796_vm4 = vmor %vm635_vm12, %vm764_vm15  ;;  %v112_v14 = vpop.permute.xlu0 %111  ;;  %v116_v18 = vpop.permute.xlu1 %115  ;;  %v1253_v19 = vsel %vm795_vm14, 1.0, %v1445_v15 }
  0xc6   :  { %vm797_vm2 = vmor %vm636_vm10, %vm765_vm1  ;;  %v1254_v17 = vsel %vm796_vm4, 1.0, %v1445_v15  ;;  %vm166_vm6 = vcmp.eq.s32.totalorder %v112_v14, %v1649_v3  ;;  %vm167_vm7 = vcmp.eq.s32.totalorder %v112_v14, %v1655_v4  ;;  %vm168_vm12 = vcmp.eq.s32.totalorder %v116_v18, %v1649_v3 }
  0xc7   :  { %708 = vbcast.lane.b32.xlu0 %v1579_v32, 260  ;;  %v1255_v20 = vsel %vm797_vm2, 1.0, %v1445_v15  ;;  %v890_v21 = vpack.c.bf16 %v1254_v17, %v1252_v16  ;;  %712 = vbcast.lane.b32.xlu1 %v1579_v32, 268  ;;  %vm169_vm0 = vcmp.eq.s32.totalorder %v116_v18, %v1655_v4 }
  0xc8   :  { %v891_v22 = vpack.c.bf16 %v1255_v20, %v1253_v19 }
  0xc9   :  { %v238_v23 = vpop.permute.xlu0 %237  ;;  %v242_v25 = vpop.permute.xlu1 %241 }
  0xca   :  { %1294 = vmatprep.mubr.msk.bf16.mxu0 %vm1939_vm3, %v891_v22  ;;  %vm295_vm8 = vcmp.eq.s32.totalorder %v238_v23, %v1649_v3  ;;  %vm296_vm5 = vcmp.eq.s32.totalorder %v238_v23, %v1655_v4  ;;  %vm297_vm11 = vcmp.eq.s32.totalorder %v242_v25, %v1649_v3  ;;  %vm298_vm13 = vcmp.eq.s32.totalorder %v242_v25, %v1655_v4 }
  0xcb   :  { %vm1698_vm9 = vmor %vm166_vm6, %vm295_vm8  ;;  %1044 = vmatmul.mubr.bf16.vlgmr.msra.gmra.mrb[0].mxu0 %v890_v21  ;;  %144 = vbcast.lane.b32.xlu0 %v1586_v36, 256 }
  0xcc   :  { %vm328_vm10 = vmor %vm167_vm7, %vm296_vm5  ;;  %148 = vbcast.lane.b32.xlu1 %v1586_v36, 264 }
  0xcd   :  { %vm329_vm14 = vmor %vm168_vm12, %vm297_vm11  ;;  %v399_v26 = vpop.permute.xlu0 %398  ;;  %v403_v27 = vpop.permute.xlu1 %402 }
  0xce   :  { %vm330_vm15 = vmor %vm169_vm0, %vm298_vm13  ;;  %vm456_vm1 = vcmp.eq.s32.totalorder %v399_v26, %v1649_v3  ;;  %vm457_vm4 = vcmp.eq.s32.totalorder %v399_v26, %v1655_v4  ;;  %vm458_vm8 = vcmp.eq.s32.totalorder %v403_v27, %v1649_v3  ;;  %vm459_vm5 = vcmp.eq.s32.totalorder %v403_v27, %v1655_v4 }
  0xcf   :  { %vm488_vm2 = vmor %vm1698_vm9, %vm456_vm1  ;;  %273 = vbcast.lane.b32.xlu0 %v1593_v40, 257 }
  0xd0   :  { %vm489_vm6 = vmor %vm328_vm10, %vm457_vm4  ;;  %277 = vbcast.lane.b32.xlu1 %v1593_v40, 265 }
  0xd1   :  { %vm490_vm7 = vmor %vm329_vm14, %vm458_vm8  ;;  %v560_v28 = vpop.permute.xlu0 %559  ;;  %v564_v29 = vpop.permute.xlu1 %563 }
  0xd2   :  { %vm491_vm12 = vmor %vm330_vm15, %vm459_vm5  ;;  %vm617_vm11 = vcmp.eq.s32.totalorder %v560_v28, %v1649_v3  ;;  %vm618_vm13 = vcmp.eq.s32.totalorder %v560_v28, %v1655_v4  ;;  %vm619_vm10 = vcmp.eq.s32.totalorder %v564_v29, %v1649_v3  ;;  %vm620_vm1 = vcmp.eq.s32.totalorder %v564_v29, %v1655_v4 }
  0xd3   :  { %vm649_vm0 = vmor %vm488_vm2, %vm617_vm11  ;;  %434 = vbcast.lane.b32.xlu0 %v1599_v43, 258 }
  0xd4   :  { %vm650_vm9 = vmor %vm489_vm6, %vm618_vm13  ;;  %438 = vbcast.lane.b32.xlu1 %v1599_v43, 266 }
  0xd5   :  { %vm651_vm4 = vmor %vm490_vm7, %vm619_vm10  ;;  %v721_v30 = vpop.permute.xlu0 %720  ;;  %v725_v31 = vpop.permute.xlu1 %724 }
  0xd6   :  { %vm652_vm14 = vmor %vm491_vm12, %vm620_vm1  ;;  %vm778_vm15 = vcmp.eq.s32.totalorder %v721_v30, %v1649_v3  ;;  %vm779_vm8 = vcmp.eq.s32.totalorder %v721_v30, %v1655_v4  ;;  %vm780_vm6 = vcmp.eq.s32.totalorder %v725_v31, %v1649_v3  ;;  %vm781_vm11 = vcmp.eq.s32.totalorder %v725_v31, %v1655_v4 }
  0xd7   :  { %vm810_vm5 = vmor %vm649_vm0, %vm778_vm15  ;;  %595 = vbcast.lane.b32.xlu0 %v1605_v46, 259 }
  0xd8   :  { %vm811_vm2 = vmor %vm650_vm9, %vm779_vm8  ;;  %599 = vbcast.lane.b32.xlu1 %v1605_v46, 267  ;;  %v1268_v33 = vsel %vm810_vm5, 1.0, %v1445_v15 }
  0xd9   :  { %vm812_vm13 = vmor %vm651_vm4, %vm780_vm6  ;;  %v79_v32 = vpop.permute.xlu0 %78  ;;  %v83_v35 = vpop.permute.xlu1 %82  ;;  %v1269_v36 = vsel %vm811_vm2, 1.0, %v1445_v15 }
  0xda   :  { %vm813_vm7 = vmor %vm652_vm14, %vm781_vm11  ;;  %v1270_v34 = vsel %vm812_vm13, 1.0, %v1445_v15  ;;  %vm154_vm12 = vcmp.eq.s32.totalorder %v79_v32, %v1649_v3  ;;  %vm155_vm10 = vcmp.eq.s32.totalorder %v79_v32, %v1655_v4  ;;  %vm156_vm4 = vcmp.eq.s32.totalorder %v83_v35, %v1649_v3 }
  0xdb   :  { %756 = vbcast.lane.b32.xlu0 %v1611_v49, 260  ;;  %v1271_v37 = vsel %vm813_vm7, 1.0, %v1445_v15  ;;  %v898_v38 = vpack.c.bf16 %v1270_v34, %v1268_v33  ;;  %vm157_vm5 = vcmp.eq.s32.totalorder %v83_v35, %v1655_v4 }
  0xdc   :  { %v899_v39 = vpack.c.bf16 %v1271_v37, %v1269_v36  ;;  %760 = vbcast.lane.b32.xlu1 %v1611_v49, 268 }
  0xdd   :  { %v202_v40 = vpop.permute.xlu0 %201  ;;  %v206_v41 = vpop.permute.xlu1 %205 }
  0xde   :  { %1298 = vmatprep.mubr.msk.bf16.mxu1 %vm1939_vm3, %v899_v39  ;;  %vm283_vm0 = vcmp.eq.s32.totalorder %v202_v40, %v1649_v3  ;;  %vm284_vm9 = vcmp.eq.s32.totalorder %v202_v40, %v1655_v4  ;;  %vm285_vm15 = vcmp.eq.s32.totalorder %v206_v41, %v1649_v3  ;;  %vm286_vm8 = vcmp.eq.s32.totalorder %v206_v41, %v1655_v4 }
  0xdf   :  { %vm315_vm1 = vmor %vm154_vm12, %vm283_vm0  ;;  %1076 = vmatmul.mubr.bf16.vlgmr.msra.gmra.mrb[0].mxu1 %v898_v38 }
  0xe0   :  { %vm316_vm14 = vmor %vm155_vm10, %vm284_vm9 }
  0xe1   :  { %vm317_vm2 = vmor %vm156_vm4, %vm285_vm15  ;;  %v363_v42 = vpop.permute.xlu0 %362  ;;  %v367_v43 = vpop.permute.xlu1 %366 }
  0xe2   :  { %vm318_vm6 = vmor %vm157_vm5, %vm286_vm8  ;;  %vm444_vm11 = vcmp.eq.s32.totalorder %v363_v42, %v1649_v3  ;;  %vm445_vm13 = vcmp.eq.s32.totalorder %v363_v42, %v1655_v4  ;;  %vm446_vm0 = vcmp.eq.s32.totalorder %v367_v43, %v1649_v3  ;;  %vm447_vm9 = vcmp.eq.s32.totalorder %v367_v43, %v1655_v4 }
  0xe3   :  { %vm476_vm7 = vmor %vm315_vm1, %vm444_vm11 }
  0xe4   :  { %vm477_vm12 = vmor %vm316_vm14, %vm445_vm13 }
  0xe5   :  { %vm478_vm10 = vmor %vm317_vm2, %vm446_vm0  ;;  %v524_v44 = vpop.permute.xlu0 %523  ;;  %v528_v45 = vpop.permute.xlu1 %527 }
  0xe6   :  { %vm479_vm3 = vmor %vm318_vm6, %vm447_vm9  ;;  %vm605_vm4 = vcmp.eq.s32.totalorder %v524_v44, %v1649_v3  ;;  %vm606_vm15 = vcmp.eq.s32.totalorder %v524_v44, %v1655_v4  ;;  %vm607_vm1 = vcmp.eq.s32.totalorder %v528_v45, %v1649_v3  ;;  %vm608_vm11 = vcmp.eq.s32.totalorder %v528_v45, %v1655_v4 }
  0xe7   :  { %vm637_vm5 = vmor %vm476_vm7, %vm605_vm4 }
  0xe8   :  { %vm638_vm8 = vmor %vm477_vm12, %vm606_vm15 }
  0xe9   :  { %vm639_vm13 = vmor %vm478_vm10, %vm607_vm1  ;;  %v685_v46 = vpop.permute.xlu0 %684  ;;  %v689_v47 = vpop.permute.xlu1 %688  ;;  %vm1942_vm10 = vcmask 261120  }
  0xea   :  { %vm640_vm14 = vmor %vm479_vm3, %vm608_vm11  ;;  %vm766_vm0 = vcmp.eq.s32.totalorder %v685_v46, %v1649_v3  ;;  %vm767_vm2 = vcmp.eq.s32.totalorder %v685_v46, %v1655_v4  ;;  %vm768_vm4 = vcmp.eq.s32.totalorder %v689_v47, %v1649_v3  ;;  %vm769_vm7 = vcmp.eq.s32.totalorder %v689_v47, %v1655_v4 }
  0xeb   :  { %vm798_vm6 = vmor %vm637_vm5, %vm766_vm0 }
  0xec   :  { %vm799_vm9 = vmor %vm638_vm8, %vm767_vm2  ;;  %v1256_v49 = vsel %vm798_vm6, 1.0, %v1445_v15 }
  0xed   :  { %vm800_vm12 = vmor %vm639_vm13, %vm768_vm4  ;;  %v123_v48 = vpop.permute.xlu0 %122  ;;  %v1257_v51 = vsel %vm799_vm9, 1.0, %v1445_v15  ;;  %v127_v53 = vpop.permute.xlu1 %126 }
  0xee   :  { %vm801_vm15 = vmor %vm640_vm14, %vm769_vm7  ;;  %v1258_v50 = vsel %vm800_vm12, 1.0, %v1445_v15  ;;  %vm170_vm3 = vcmp.eq.s32.totalorder %v123_v48, %v1649_v3  ;;  %vm171_vm1 = vcmp.eq.s32.totalorder %v123_v48, %v1655_v4  ;;  %vm172_vm13 = vcmp.eq.s32.totalorder %v127_v53, %v1649_v3 }
  0xef   :  { %v1259_v52 = vsel %vm801_vm15, 1.0, %v1445_v15  ;;  %v892_v54 = vpack.c.bf16 %v1258_v50, %v1256_v49  ;;  %vm173_vm6 = vcmp.eq.s32.totalorder %v127_v53, %v1655_v4 }
  0xf0   :  { %v893_v55 = vpack.c.bf16 %v1259_v52, %v1257_v51 }
  0xf1   :  { %v250_v56 = vpop.permute.xlu0 %249  ;;  %v254_v57 = vpop.permute.xlu1 %253 }
  0xf2   :  { %1295 = vmatprep.mubr.msk.bf16.mxu0 %vm1942_vm10, %v893_v55  ;;  %vm299_vm5 = vcmp.eq.s32.totalorder %v250_v56, %v1649_v3  ;;  %vm300_vm8 = vcmp.eq.s32.totalorder %v250_v56, %v1655_v4  ;;  %vm301_vm0 = vcmp.eq.s32.totalorder %v254_v57, %v1649_v3  ;;  %vm302_vm2 = vcmp.eq.s32.totalorder %v254_v57, %v1655_v4 }
  0xf3   :  { %vm331_vm11 = vmor %vm170_vm3, %vm299_vm5  ;;  %1052 = vmatmul.mubr.bf16.gmra.mrb[4].mxu0 %v892_v54 }
  0xf4   :  { %vm332_vm14 = vmor %vm171_vm1, %vm300_vm8 }
  0xf5   :  { %vm333_vm9 = vmor %vm172_vm13, %vm301_vm0  ;;  %v411_v58 = vpop.permute.xlu0 %410  ;;  %v415_v59 = vpop.permute.xlu1 %414 }
  0xf6   :  { %vm334_vm4 = vmor %vm173_vm6, %vm302_vm2  ;;  %vm460_vm7 = vcmp.eq.s32.totalorder %v411_v58, %v1649_v3  ;;  %vm461_vm12 = vcmp.eq.s32.totalorder %v411_v58, %v1655_v4  ;;  %vm462_vm10 = vcmp.eq.s32.totalorder %v415_v59, %v1649_v3  ;;  %vm463_vm5 = vcmp.eq.s32.totalorder %v415_v59, %v1655_v4 }
  0xf7   :  { %vm492_vm15 = vmor %vm331_vm11, %vm460_vm7 }
  0xf8   :  { %vm493_vm3 = vmor %vm332_vm14, %vm461_vm12 }
  0xf9   :  { %vm494_vm8 = vmor %vm333_vm9, %vm462_vm10  ;;  %v572_v60 = vpop.permute.xlu0 %571  ;;  %v576_v61 = vpop.permute.xlu1 %575 }
  0xfa   :  { %vm495_vm1 = vmor %vm334_vm4, %vm463_vm5  ;;  %vm621_vm0 = vcmp.eq.s32.totalorder %v572_v60, %v1649_v3  ;;  %vm622_vm13 = vcmp.eq.s32.totalorder %v572_v60, %v1655_v4  ;;  %vm623_vm7 = vcmp.eq.s32.totalorder %v576_v61, %v1649_v3  ;;  %vm624_vm11 = vcmp.eq.s32.totalorder %v576_v61, %v1655_v4 }
  0xfb   :  { %vm653_vm2 = vmor %vm492_vm15, %vm621_vm0 }
  0xfc   :  { %vm654_vm6 = vmor %vm493_vm3, %vm622_vm13 }
  0xfd   :  { %vm655_vm12 = vmor %vm494_vm8, %vm623_vm7  ;;  %v733_v62 = vpop.permute.xlu0 %732  ;;  %v737_v63 = vpop.permute.xlu1 %736 }
  0xfe   :  { %vm656_vm14 = vmor %vm495_vm1, %vm624_vm11  ;;  %vm782_vm9 = vcmp.eq.s32.totalorder %v733_v62, %v1649_v3  ;;  %vm783_vm10 = vcmp.eq.s32.totalorder %v733_v62, %v1655_v4  ;;  %vm784_vm0 = vcmp.eq.s32.totalorder %v737_v63, %v1649_v3  ;;  %vm785_vm15 = vcmp.eq.s32.totalorder %v737_v63, %v1655_v4 }
  0xff   :  { %vm814_vm4 = vmor %vm653_vm2, %vm782_vm9  ;;  %vm1943_vm1 = vcmask 261120  }
 0x100   :  { %vm815_vm5 = vmor %vm654_vm6, %vm783_vm10  ;;  %v1272_v2 = vsel %vm814_vm4, 1.0, %v1445_v15 }
 0x101   :  { %vm816_vm3 = vmor %vm655_vm12, %vm784_vm0  ;;  %v90_v1 = vpop.permute.xlu0 %89  ;;  %v1273_v6 = vsel %vm815_vm5, 1.0, %v1445_v15  ;;  %v94_v7 = vpop.permute.xlu1 %93 }
 0x102   :  { %vm817_vm13 = vmor %vm656_vm14, %vm785_vm15  ;;  %v1274_v5 = vsel %vm816_vm3, 1.0, %v1445_v15  ;;  %vm158_vm8 = vcmp.eq.s32.totalorder %v90_v1, %v1649_v3  ;;  %vm159_vm7 = vcmp.eq.s32.totalorder %v90_v1, %v1655_v4  ;;  %vm160_vm12 = vcmp.eq.s32.totalorder %v94_v7, %v1649_v3 }
 0x103   :  { %v1275_v0 = vsel %vm817_vm13, 1.0, %v1445_v15  ;;  %v900_v8 = vpack.c.bf16 %v1274_v5, %v1272_v2  ;;  %vm161_vm4 = vcmp.eq.s32.totalorder %v94_v7, %v1655_v4 }
 0x104   :  { %v901_v9 = vpack.c.bf16 %v1275_v0, %v1273_v6 }
 0x105   :  { %v214_v10 = vpop.permute.xlu0 %213  ;;  %v218_v11 = vpop.permute.xlu1 %217 }
 0x106   :  { %1299 = vmatprep.mubr.msk.bf16.mxu1 %vm1943_vm1, %v901_v9  ;;  %vm287_vm2 = vcmp.eq.s32.totalorder %v214_v10, %v1649_v3  ;;  %vm288_vm6 = vcmp.eq.s32.totalorder %v214_v10, %v1655_v4  ;;  %vm289_vm9 = vcmp.eq.s32.totalorder %v218_v11, %v1649_v3  ;;  %vm290_vm10 = vcmp.eq.s32.totalorder %v218_v11, %v1655_v4 }
 0x107   :  { %vm319_vm11 = vmor %vm158_vm8, %vm287_vm2  ;;  %1084 = vmatmul.mubr.bf16.gmra.mrb[4].mxu1 %v900_v8 }
 0x108   :  { %vm320_vm14 = vmor %vm159_vm7, %vm288_vm6 }
 0x109   :  { %vm321_vm5 = vmor %vm160_vm12, %vm289_vm9  ;;  %v375_v12 = vpop.permute.xlu0 %374  ;;  %v379_v13 = vpop.permute.xlu1 %378 }
 0x10a   :  { %vm322_vm0 = vmor %vm161_vm4, %vm290_vm10  ;;  %vm448_vm15 = vcmp.eq.s32.totalorder %v375_v12, %v1649_v3  ;;  %vm449_vm3 = vcmp.eq.s32.totalorder %v375_v12, %v1655_v4  ;;  %vm450_vm1 = vcmp.eq.s32.totalorder %v379_v13, %v1649_v3  ;;  %vm451_vm2 = vcmp.eq.s32.totalorder %v379_v13, %v1655_v4  ;;  %v1885_v12 = vld [vmem:[#allocation7] sm:$0xff] }
 0x10b   :  { %vm480_vm13 = vmor %vm319_vm11, %vm448_vm15 }
 0x10c   :  { %vm481_vm8 = vmor %vm320_vm14, %vm449_vm3 }
 0x10d   :  { %vm482_vm6 = vmor %vm321_vm5, %vm450_vm1  ;;  %v536_v14 = vpop.permute.xlu0 %535  ;;  %v540_v16 = vpop.permute.xlu1 %539 }
 0x10e   :  { %vm483_vm7 = vmor %vm322_vm0, %vm451_vm2  ;;  %vm609_vm9 = vcmp.eq.s32.totalorder %v536_v14, %v1649_v3  ;;  %vm610_vm12 = vcmp.eq.s32.totalorder %v536_v14, %v1655_v4  ;;  %vm611_vm11 = vcmp.eq.s32.totalorder %v540_v16, %v1649_v3  ;;  %vm612_vm15 = vcmp.eq.s32.totalorder %v540_v16, %v1655_v4 }
 0x10f   :  { %vm641_vm4 = vmor %vm480_vm13, %vm609_vm9 }
 0x110   :  { %vm642_vm10 = vmor %vm481_vm8, %vm610_vm12 }
 0x111   :  { %vm643_vm3 = vmor %vm482_vm6, %vm611_vm11  ;;  %v697_v17 = vpop.permute.xlu0 %696  ;;  %v701_v18 = vpop.permute.xlu1 %700 }
 0x112   :  { %vm644_vm14 = vmor %vm483_vm7, %vm612_vm15  ;;  %vm770_vm1 = vcmp.eq.s32.totalorder %v697_v17, %v1649_v3  ;;  %vm771_vm5 = vcmp.eq.s32.totalorder %v697_v17, %v1655_v4  ;;  %vm772_vm9 = vcmp.eq.s32.totalorder %v701_v18, %v1649_v3  ;;  %vm773_vm13 = vcmp.eq.s32.totalorder %v701_v18, %v1655_v4 }
 0x113   :  { %vm802_vm0 = vmor %vm641_vm4, %vm770_vm1  ;;  %vm1944_vm7 = vcmask 261120  }
 0x114   :  { %vm803_vm2 = vmor %vm642_vm10, %vm771_vm5  ;;  %v1260_v20 = vsel %vm802_vm0, 1.0, %v1445_v15 }
 0x115   :  { %vm804_vm8 = vmor %vm643_vm3, %vm772_vm9  ;;  %v134_v19 = vpop.permute.xlu0 %133  ;;  %v1261_v22 = vsel %vm803_vm2, 1.0, %v1445_v15  ;;  %v138_v24 = vpop.permute.xlu1 %137 }
 0x116   :  { %vm805_vm12 = vmor %vm644_vm14, %vm773_vm13  ;;  %v1262_v21 = vsel %vm804_vm8, 1.0, %v1445_v15  ;;  %vm174_vm6 = vcmp.eq.s32.totalorder %v134_v19, %v1649_v3  ;;  %vm175_vm11 = vcmp.eq.s32.totalorder %v134_v19, %v1655_v4  ;;  %vm176_vm3 = vcmp.eq.s32.totalorder %v138_v24, %v1649_v3 }
 0x117   :  { %v1263_v23 = vsel %vm805_vm12, 1.0, %v1445_v15  ;;  %v894_v25 = vpack.c.bf16 %v1262_v21, %v1260_v20  ;;  %vm177_vm0 = vcmp.eq.s32.totalorder %v138_v24, %v1655_v4 }
 0x118   :  { %v895_v26 = vpack.c.bf16 %v1263_v23, %v1261_v22 }
 0x119   :  { %v262_v27 = vpop.permute.xlu0 %261  ;;  %v266_v28 = vpop.permute.xlu1 %265 }
 0x11a   :  { %1296 = vmatprep.mubr.msk.bf16.mxu0 %vm1944_vm7, %v895_v26  ;;  %vm303_vm4 = vcmp.eq.s32.totalorder %v262_v27, %v1649_v3  ;;  %vm304_vm10 = vcmp.eq.s32.totalorder %v262_v27, %v1655_v4  ;;  %vm305_vm1 = vcmp.eq.s32.totalorder %v266_v28, %v1649_v3  ;;  %vm306_vm5 = vcmp.eq.s32.totalorder %v266_v28, %v1655_v4 }
 0x11b   :  { %vm335_vm15 = vmor %vm174_vm6, %vm303_vm4  ;;  %1060 = vmatmul.mubr.bf16.gmra.mrb[8].mxu0 %v894_v25 }
 0x11c   :  { %vm336_vm14 = vmor %vm175_vm11, %vm304_vm10 }
 0x11d   :  { %vm337_vm2 = vmor %vm176_vm3, %vm305_vm1  ;;  %v423_v29 = vpop.permute.xlu0 %422  ;;  %v427_v30 = vpop.permute.xlu1 %426 }
 0x11e   :  { %vm338_vm9 = vmor %vm177_vm0, %vm306_vm5  ;;  %vm464_vm13 = vcmp.eq.s32.totalorder %v423_v29, %v1649_v3  ;;  %vm465_vm8 = vcmp.eq.s32.totalorder %v423_v29, %v1655_v4  ;;  %vm466_vm7 = vcmp.eq.s32.totalorder %v427_v30, %v1649_v3  ;;  %vm467_vm4 = vcmp.eq.s32.totalorder %v427_v30, %v1655_v4 }
 0x11f   :  { %vm496_vm12 = vmor %vm335_vm15, %vm464_vm13 }
 0x120   :  { %vm497_vm6 = vmor %vm336_vm14, %vm465_vm8 }
 0x121   :  { %vm498_vm10 = vmor %vm337_vm2, %vm466_vm7  ;;  %v584_v31 = vpop.permute.xlu0 %583  ;;  %v588_v32 = vpop.permute.xlu1 %587 }
 0x122   :  { %vm499_vm11 = vmor %vm338_vm9, %vm467_vm4  ;;  %vm625_vm1 = vcmp.eq.s32.totalorder %v584_v31, %v1649_v3  ;;  %vm626_vm3 = vcmp.eq.s32.totalorder %v584_v31, %v1655_v4  ;;  %vm627_vm13 = vcmp.eq.s32.totalorder %v588_v32, %v1649_v3  ;;  %vm628_vm15 = vcmp.eq.s32.totalorder %v588_v32, %v1655_v4 }
 0x123   :  { %vm657_vm0 = vmor %vm496_vm12, %vm625_vm1 }
 0x124   :  { %vm658_vm5 = vmor %vm497_vm6, %vm626_vm3 }
 0x125   :  { %vm659_vm8 = vmor %vm498_vm10, %vm627_vm13  ;;  %v745_v33 = vpop.permute.xlu0 %744  ;;  %v749_v34 = vpop.permute.xlu1 %748 }
 0x126   :  { %vm660_vm14 = vmor %vm499_vm11, %vm628_vm15  ;;  %vm786_vm2 = vcmp.eq.s32.totalorder %v745_v33, %v1649_v3  ;;  %vm787_vm7 = vcmp.eq.s32.totalorder %v745_v33, %v1655_v4  ;;  %vm788_vm1 = vcmp.eq.s32.totalorder %v749_v34, %v1649_v3  ;;  %vm789_vm12 = vcmp.eq.s32.totalorder %v749_v34, %v1655_v4 }
 0x127   :  { %vm818_vm4 = vmor %vm657_vm0, %vm786_vm2  ;;  %vm1945_vm11 = vcmask 261120  }
 0x128   :  { %vm819_vm9 = vmor %vm658_vm5, %vm787_vm7  ;;  %v1276_v36 = vsel %vm818_vm4, 1.0, %v1445_v15 }
 0x129   :  { %vm820_vm3 = vmor %vm659_vm8, %vm788_vm1  ;;  %v101_v35 = vpop.permute.xlu0 %100  ;;  %v1277_v38 = vsel %vm819_vm9, 1.0, %v1445_v15  ;;  %v105_v40 = vpop.permute.xlu1 %104 }
 0x12a   :  { %vm821_vm6 = vmor %vm660_vm14, %vm789_vm12  ;;  %v1278_v37 = vsel %vm820_vm3, 1.0, %v1445_v15  ;;  %vm162_vm10 = vcmp.eq.s32.totalorder %v101_v35, %v1649_v3  ;;  %vm163_vm13 = vcmp.eq.s32.totalorder %v101_v35, %v1655_v4  ;;  %vm164_vm8 = vcmp.eq.s32.totalorder %v105_v40, %v1649_v3 }
 0x12b   :  { %v1279_v39 = vsel %vm821_vm6, 1.0, %v1445_v15  ;;  %v902_v41 = vpack.c.bf16 %v1278_v37, %v1276_v36  ;;  %vm165_vm4 = vcmp.eq.s32.totalorder %v105_v40, %v1655_v4 }
 0x12c   :  { %v903_v42 = vpack.c.bf16 %v1279_v39, %v1277_v38 }
 0x12d   :  { %v226_v43 = vpop.permute.xlu0 %225  ;;  %v230_v44 = vpop.permute.xlu1 %229 }
 0x12e   :  { %1300 = vmatprep.mubr.msk.bf16.mxu1 %vm1945_vm11, %v903_v42  ;;  %vm291_vm0 = vcmp.eq.s32.totalorder %v226_v43, %v1649_v3  ;;  %vm292_vm5 = vcmp.eq.s32.totalorder %v226_v43, %v1655_v4  ;;  %vm293_vm2 = vcmp.eq.s32.totalorder %v230_v44, %v1649_v3  ;;  %vm294_vm7 = vcmp.eq.s32.totalorder %v230_v44, %v1655_v4  ;;  %v1900_v43 = vld [vmem:[%s1936_s2] ss:$0 sm:$0xff]  ;;  %s1446_s2 = smov [#allocation8]  }
 0x12f   :  { %vm323_vm15 = vmor %vm162_vm10, %vm291_vm0  ;;  %1092 = vmatmul.mubr.bf16.gmra.mrb[8].mxu1 %v902_v41  ;;  %s1242_s28 = sshll.u32 %s1446_s2, 4  ;;  %s1243_s28 = int_to_ptr.vmem [resolvable:$true] %s1242_s28 }
 0x130   :  { %vm324_vm14 = vmor %vm163_vm13, %vm292_vm5  ;;  %s1409_s29 = scalar_lea.vmem %s1243_s28, 128  ;;  %p1414_p11 = scmp.lt.s32.totalorder %s1243_s28, %s1243_s28 }
 0x131   :  { %vm325_vm9 = vmor %vm164_vm8, %vm293_vm2  ;;  %v387_v45 = vpop.permute.xlu0 %386  ;;  %v391_v46 = vpop.permute.xlu1 %390  ;;  %p1410_p10 = scmp.ne.s32.totalorder %s1243_s28, %s1409_s29  ;;  %p1415_p12 = scmp.lt.s32.totalorder %s1409_s29, %s1409_s29 }
 0x132   :  { %vm326_vm1 = vmor %vm165_vm4, %vm294_vm7  ;;  %vm452_vm12 = vcmp.eq.s32.totalorder %v387_v45, %v1649_v3  ;;  %vm453_vm3 = vcmp.eq.s32.totalorder %v387_v45, %v1655_v4  ;;  %vm454_vm11 = vcmp.eq.s32.totalorder %v391_v46, %v1649_v3  ;;  %vm455_vm0 = vcmp.eq.s32.totalorder %v391_v46, %v1655_v4 }
 0x133   :  { %vm484_vm6 = vmor %vm323_vm15, %vm452_vm12  ;;  %p1416_p13 = por %p1415_p12, %p1414_p11 }
 0x134   :  { %vm485_vm10 = vmor %vm324_vm14, %vm453_vm3 }
 0x135   :  { %vm486_vm5 = vmor %vm325_vm9, %vm454_vm11  ;;  %v548_v47 = vpop.permute.xlu0 %547  ;;  %v552_v48 = vpop.permute.xlu1 %551  ;;  %p1417_p0 = pnand %p1416_p13, %p1410_p10 }
 0x136   :  { %vm487_vm13 = vmor %vm326_vm1, %vm455_vm0  ;;  %vm613_vm2 = vcmp.eq.s32.totalorder %v548_v47, %v1649_v3  ;;  %vm614_vm8 = vcmp.eq.s32.totalorder %v548_v47, %v1655_v4  ;;  %vm615_vm12 = vcmp.eq.s32.totalorder %v552_v48, %v1649_v3  ;;  %vm616_vm15 = vcmp.eq.s32.totalorder %v552_v48, %v1655_v4 }
 0x137   :  { %vm645_vm4 = vmor %vm484_vm6, %vm613_vm2 }
 0x138   :  { %vm646_vm7 = vmor %vm485_vm10, %vm614_vm8 }
 0x139   :  { %vm647_vm3 = vmor %vm486_vm5, %vm615_vm12  ;;  %v709_v49 = vpop.permute.xlu0 %708  ;;  %v713_v50 = vpop.permute.xlu1 %712 }
 0x13a   :  { %vm648_vm14 = vmor %vm487_vm13, %vm616_vm15  ;;  %vm774_vm9 = vcmp.eq.s32.totalorder %v709_v49, %v1649_v3  ;;  %vm775_vm11 = vcmp.eq.s32.totalorder %v709_v49, %v1655_v4  ;;  %vm776_vm2 = vcmp.eq.s32.totalorder %v713_v50, %v1649_v3  ;;  %vm777_vm6 = vcmp.eq.s32.totalorder %v713_v50, %v1655_v4 }
 0x13b   :  { %vm806_vm0 = vmor %vm645_vm4, %vm774_vm9  ;;  %vm1946_vm13 = vcmask 261120  }
 0x13c   :  { %vm807_vm1 = vmor %vm646_vm7, %vm775_vm11  ;;  %v1264_v52 = vsel %vm806_vm0, 1.0, %v1445_v15 }
 0x13d   :  { %vm808_vm8 = vmor %vm647_vm3, %vm776_vm2  ;;  %v145_v51 = vpop.permute.xlu0 %144  ;;  %v1265_v54 = vsel %vm807_vm1, 1.0, %v1445_v15 }
 0x13e   :  { %vm809_vm10 = vmor %vm648_vm14, %vm777_vm6  ;;  %v1266_v53 = vsel %vm808_vm8, 1.0, %v1445_v15  ;;  %v149_v56 = vpop.permute.xlu1 %148  ;;  %vm178_vm5 = vcmp.eq.s32.totalorder %v145_v51, %v1649_v3  ;;  %vm179_vm12 = vcmp.eq.s32.totalorder %v145_v51, %v1655_v4 }
 0x13f   :  { %v1267_v55 = vsel %vm809_vm10, 1.0, %v1445_v15  ;;  %v896_v57 = vpack.c.bf16 %v1266_v53, %v1264_v52  ;;  %vm180_vm3 = vcmp.eq.s32.totalorder %v149_v56, %v1649_v3  ;;  %vm181_vm0 = vcmp.eq.s32.totalorder %v149_v56, %v1655_v4 }
 0x140   :  { %v897_v58 = vpack.c.bf16 %v1267_v55, %v1265_v54 }
 0x141   :  { %v274_v59 = vpop.permute.xlu0 %273 }
 0x142   :  { %1297 = vmatprep.mubr.msk.bf16.mxu0 %vm1946_vm13, %v897_v58  ;;  %vm307_vm4 = vcmp.eq.s32.totalorder %v274_v59, %v1649_v3  ;;  %vm308_vm7 = vcmp.eq.s32.totalorder %v274_v59, %v1655_v4  ;;  %v278_v60 = vpop.permute.xlu1 %277 }
 0x143   :  { %vm339_vm15 = vmor %vm178_vm5, %vm307_vm4  ;;  %1068 = vmatmul.mubr.bf16.gmra.mrb[12].mxu0 %v896_v57  ;;  %vm309_vm9 = vcmp.eq.s32.totalorder %v278_v60, %v1649_v3  ;;  %vm310_vm11 = vcmp.eq.s32.totalorder %v278_v60, %v1655_v4 }
 0x144   :  { %vm340_vm14 = vmor %vm179_vm12, %vm308_vm7 }
 0x145   :  { %vm341_vm1 = vmor %vm180_vm3, %vm309_vm9  ;;  %v435_v61 = vpop.permute.xlu0 %434 }
 0x146   :  { %vm342_vm2 = vmor %vm181_vm0, %vm310_vm11  ;;  %vm468_vm6 = vcmp.eq.s32.totalorder %v435_v61, %v1649_v3  ;;  %vm469_vm8 = vcmp.eq.s32.totalorder %v435_v61, %v1655_v4  ;;  %v439_v62 = vpop.permute.xlu1 %438 }
 0x147   :  { %vm500_vm10 = vmor %vm339_vm15, %vm468_vm6  ;;  %vm470_vm13 = vcmp.eq.s32.totalorder %v439_v62, %v1649_v3  ;;  %vm471_vm4 = vcmp.eq.s32.totalorder %v439_v62, %v1655_v4 }
 0x148   :  { %vm501_vm5 = vmor %vm340_vm14, %vm469_vm8 }
 0x149   :  { %vm502_vm7 = vmor %vm341_vm1, %vm470_vm13  ;;  %v596_v63 = vpop.permute.xlu0 %595 }
 0x14a   :  { %vm503_vm12 = vmor %vm342_vm2, %vm471_vm4  ;;  %vm629_vm3 = vcmp.eq.s32.totalorder %v596_v63, %v1649_v3  ;;  %vm630_vm9 = vcmp.eq.s32.totalorder %v596_v63, %v1655_v4  ;;  %v600_v1 = vpop.permute.xlu1 %599 }
 0x14b   :  { %vm661_vm11 = vmor %vm500_vm10, %vm629_vm3  ;;  %vm631_vm0 = vcmp.eq.s32.totalorder %v600_v1, %v1649_v3  ;;  %vm632_vm6 = vcmp.eq.s32.totalorder %v600_v1, %v1655_v4 }
 0x14c   :  { %vm662_vm15 = vmor %vm501_vm5, %vm630_vm9 }
 0x14d   :  { %v757_v2 = vpop.permute.xlu0 %756  ;;  %vm663_vm14 = vmor %vm502_vm7, %vm631_vm0  ;;  %vm1947_vm7 = vcmask 261120   ;;  %vm1220_vm0 = vcmask 1043459  }
 0x14e   :  { %vm790_vm8 = vcmp.eq.s32.totalorder %v757_v2, %v1649_v3  ;;  %vm791_vm1 = vcmp.eq.s32.totalorder %v757_v2, %v1655_v4  ;;  %vm664_vm13 = vmor %vm503_vm12, %vm632_vm6  ;;  %v761_v5 = vpop.permute.xlu1 %760  ;;  %vm1214_vm12 = vcmask 1041409   ;;  %vm1223_vm6 = vcmask 1044484  }
 0x14f   :  { %vm822_vm2 = vmor %vm661_vm11, %vm790_vm8  ;;  %vm792_vm3 = vcmp.eq.s32.totalorder %v761_v5, %v1649_v3  ;;  %vm793_vm10 = vcmp.eq.s32.totalorder %v761_v5, %v1655_v4  ;;  %v1887_v3 = vld [vmem:[#allocation7 + $0x8] sm:$0xff]  ;;  %vm1217_vm11 = vcmask 1042434   ;;  %vm1232_vm8 = vcmask 1047559  }
 0x150   :  { %vm823_vm4 = vmor %vm662_vm15, %vm791_vm1  ;;  %v1280_v6 = vsel %vm822_vm2, 1.0, %v1445_v15  ;;  %vm1226_vm15 = vcmask 1045509  }
 0x151   :  { %vm824_vm5 = vmor %vm663_vm14, %vm792_vm3  ;;  %v1281_v7 = vsel %vm823_vm4, 1.0, %v1445_v15  ;;  %vm1229_vm14 = vcmask 1046534  }
 0x152   :  { %vm825_vm9 = vmor %vm664_vm13, %vm793_vm10  ;;  %v1282_v0 = vsel %vm824_vm5, 1.0, %v1445_v15 }
 0x153   :  { %v1283_v8 = vsel %vm825_vm9, 1.0, %v1445_v15  ;;  %v904_v9 = vpack.c.bf16 %v1282_v0, %v1280_v6 }
 0x154   :  { %v905_v10 = vpack.c.bf16 %v1283_v8, %v1281_v7 }
 0x156   :  { %1301 = vmatprep.mubr.msk.bf16.mxu1 %vm1947_vm7, %v905_v10 }
 0x157   :  { %1100 = vmatmul.mubr.bf16.gmra.mrb[12].mxu1 %v904_v9 }
 0x19e   :  { %v1045_v11 = vpop.f32.mrb[0].mxu0 }
 0x19f   :  { %v1047_v4 = vpop.f32.mrb[1].mxu0  ;;  %v1110_v14 = vadd.f32 %v1885_v12, %v1045_v11 }
 0x1a0   :  { %v1048_v13 = vpop.f32.mrb[2].mxu0 }
 0x1a1   :  { %v1111_v16 = vadd.f32 %v1887_v3, %v1048_v13  ;;  %v1050_v17 = vpop.f32.mrb[3].mxu0 }
 0x1a3   :  { %v1126_v18 = vmax.f32 %v1110_v14, %v1111_v16 }
 0x1a5   :  { %v1127_v25 = vrot.slane %v1126_v18, 4 }
 0x1a7   :  { %v1128_v26 = vmax.f32 %v1126_v18, %v1127_v25 }
 0x1a9   :  { %v1129_v30 = vrot.slane %v1128_v26, 2 }
 0x1ab   :  { %v1130_v35 = vmax.f32 %v1128_v26, %v1129_v30 }
 0x1ad   :  { %v1131_v38 = vrot.slane %v1130_v35, 1 }
 0x1af   :  { %v1132_v41 = vmax.f32 %v1130_v35, %v1131_v38 }
 0x1b1   :  { %v1189_v45 = vadd.f32 %v1900_v43, %v1132_v41 }
 0x1b2   :  { %v1077_v19 = vpop.f32.mrb[0].mxu1 }
 0x1b3   :  { %v1079_v15 = vpop.f32.mrb[1].mxu1  ;;  %v1118_v21 = vadd.f32 %v1885_v12, %v1077_v19  ;;  %v1197_v51 = vmax.f32 %v1189_v45, 0.0 }
 0x1b4   :  { %v1080_v20 = vpop.f32.mrb[2].mxu1 }
 0x1b5   :  { %v1119_v22 = vadd.f32 %v1887_v3, %v1080_v20  ;;  %v1082_v23 = vpop.f32.mrb[3].mxu1 }
 0x1b7   :  { %v1893_v24 = vmax.f32 %v1118_v21, %v1119_v22 }
 0x1b9   :  { %v1155_v20 = vrot.slane %v1893_v24, 4 }
 0x1bb   :  { %v1156_v23 = vmax.f32 %v1893_v24, %v1155_v20 }
 0x1c6   :  { %v1053_v27 = vpop.f32.mrb[4].mxu0 }
 0x1c7   :  { %v1055_v28 = vpop.f32.mrb[5].mxu0  ;;  %v1112_v31 = vadd.f32 %v1885_v12, %v1053_v27  ;;  %v1157_v27 = vrot.slane %v1156_v23, 2 }
 0x1c8   :  { %v1056_v29 = vpop.f32.mrb[6].mxu0 }
 0x1c9   :  { %v1113_v32 = vadd.f32 %v1887_v3, %v1056_v29  ;;  %v1058_v33 = vpop.f32.mrb[7].mxu0 }
 0x1cb   :  { %v1133_v34 = vmax.f32 %v1112_v31, %v1113_v32 }
 0x1cd   :  { %v1134_v36 = vrot.slane %v1133_v34, 4 }
 0x1cf   :  { %v1135_v37 = vmax.f32 %v1133_v34, %v1134_v36  ;;  %v1158_v36 = vmax.f32 %v1156_v23, %v1157_v27 }
 0x1d1   :  { %v1136_v39 = vrot.slane %v1135_v37, 2  ;;  %v1159_v41 = vrot.slane %v1158_v36, 1 }
 0x1d3   :  { %v1137_v40 = vmax.f32 %v1135_v37, %v1136_v39 }
 0x1d5   :  { %v1138_v42 = vrot.slane %v1137_v40, 1 }
 0x1d7   :  { %v1139_v44 = vmax.f32 %v1137_v40, %v1138_v42 }
 0x1d9   :  { %v1190_v46 = vadd.f32 %v1900_v43, %v1139_v44 }
 0x1da   :  { %v1085_v47 = vpop.f32.mrb[4].mxu1 }
 0x1db   :  { %v1198_v48 = vmax.f32 %v1190_v46, 0.0  ;;  %v1087_v49 = vpop.f32.mrb[5].mxu1  ;;  %v1120_v53 = vadd.f32 %v1885_v12, %v1085_v47  ;;  %v1160_v46 = vmax.f32 %v1158_v36, %v1159_v41 }
 0x1dc   :  { %v1088_v50 = vpop.f32.mrb[6].mxu1 }
 0x1dd   :  { %v1213_v52 = vrot.slane %v1198_v48, 7  ;;  %v1121_v54 = vadd.f32 %v1887_v3, %v1088_v50  ;;  %v1090_v55 = vpop.f32.mrb[7].mxu1 }
 0x1df   :  { %v1215_v56 = vsel %vm1214_vm12, %v1213_v52, %v1197_v51  ;;  %v1161_v57 = vmax.f32 %v1120_v53, %v1121_v54  ;;  %v1193_v51 = vadd.f32 %v1900_v43, %v1160_v46 }
 0x1e1   :  { %v1162_v21 = vrot.slane %v1161_v57, 4 }
 0x1e3   :  { %v1163_v25 = vmax.f32 %v1161_v57, %v1162_v21 }
 0x1e5   :  { %v1164_v29 = vrot.slane %v1163_v25, 2 }
 0x1e7   :  { %v1165_v37 = vmax.f32 %v1163_v25, %v1164_v29 }
 0x1e9   :  { %v1166_v24 = vrot.slane %v1165_v37, 1 }
 0x1eb   :  { %v1167_v47 = vmax.f32 %v1165_v37, %v1166_v24 }
 0x1ed   :  { %v1194_v52 = vadd.f32 %v1900_v43, %v1167_v47 }
 0x1ee   :  { %v1061_v58 = vpop.f32.mrb[8].mxu0 }
 0x1ef   :  { %v1063_v59 = vpop.f32.mrb[9].mxu0  ;;  %v1114_v61 = vadd.f32 %v1885_v12, %v1061_v58  ;;  %v1202_v58 = vmax.f32 %v1194_v52, 0.0 }
 0x1f0   :  { %v1064_v60 = vpop.f32.mrb[10].mxu0 }
 0x1f1   :  { %v1115_v62 = vadd.f32 %v1887_v3, %v1064_v60  ;;  %v1066_v63 = vpop.f32.mrb[11].mxu0 }
 0x1f3   :  { %v1140_v1 = vmax.f32 %v1114_v61, %v1115_v62 }
 0x1f5   :  { %v1141_v2 = vrot.slane %v1140_v1, 4 }
 0x1f7   :  { %v1142_v5 = vmax.f32 %v1140_v1, %v1141_v2 }
 0x1f9   :  { %v1143_v6 = vrot.slane %v1142_v5, 2 }
 0x1fb   :  { %v1144_v0 = vmax.f32 %v1142_v5, %v1143_v6 }
 0x1fd   :  { %v1145_v7 = vrot.slane %v1144_v0, 1 }
 0x1ff   :  { %v1146_v8 = vmax.f32 %v1144_v0, %v1145_v7  ;;  %v1225_v0 = vrot.slane %v1202_v58, 3 }
 0x201   :  { %v1191_v9 = vadd.f32 %v1900_v43, %v1146_v8 }
 0x202   :  { %v1093_v10 = vpop.f32.mrb[8].mxu1 }
 0x203   :  { %v1199_v11 = vmax.f32 %v1191_v9, 0.0  ;;  %v1095_v4 = vpop.f32.mrb[9].mxu1  ;;  %v1122_v16 = vadd.f32 %v1885_v12, %v1093_v10 }
 0x204   :  { %v1096_v13 = vpop.f32.mrb[10].mxu1 }
 0x205   :  { %v1216_v14 = vrot.slane %v1199_v11, 6  ;;  %v1123_v17 = vadd.f32 %v1887_v3, %v1096_v13  ;;  %v1098_v18 = vpop.f32.mrb[11].mxu1 }
 0x207   :  { %v1168_v19 = vmax.f32 %v1122_v16, %v1123_v17  ;;  %v1218_v15 = vsel %vm1217_vm11, %v1216_v14, %v1215_v56  ;;  %v1201_v56 = vmax.f32 %v1193_v51, 0.0 }
 0x209   :  { %v1169_v22 = vrot.slane %v1168_v19, 4  ;;  %v1222_v6 = vrot.slane %v1201_v56, 4 }
 0x20b   :  { %v1170_v26 = vmax.f32 %v1168_v19, %v1169_v22 }
 0x20d   :  { %v1171_v31 = vrot.slane %v1170_v26, 2 }
 0x20f   :  { %v1172_v39 = vmax.f32 %v1170_v26, %v1171_v31 }
 0x211   :  { %v1173_v44 = vrot.slane %v1172_v39, 1 }
 0x213   :  { %v1174_v49 = vmax.f32 %v1172_v39, %v1173_v44 }
 0x215   :  { %v1195_v54 = vadd.f32 %v1900_v43, %v1174_v49 }
 0x216   :  { %v1069_v28 = vpop.f32.mrb[12].mxu0 }
 0x217   :  { %v1071_v30 = vpop.f32.mrb[13].mxu0  ;;  %v1116_v33 = vadd.f32 %v1885_v12, %v1069_v28  ;;  %v1203_v62 = vmax.f32 %v1195_v54, 0.0 }
 0x218   :  { %v1072_v32 = vpop.f32.mrb[14].mxu0 }
 0x219   :  { %v1117_v34 = vadd.f32 %v1887_v3, %v1072_v32  ;;  %v1074_v35 = vpop.f32.mrb[15].mxu0  ;;  %v1228_v10 = vrot.slane %v1203_v62, 2 }
 0x21b   :  { %v1147_v38 = vmax.f32 %v1116_v33, %v1117_v34 }
 0x21d   :  { %v1148_v40 = vrot.slane %v1147_v38, 4 }
 0x21f   :  { %v1149_v42 = vmax.f32 %v1147_v38, %v1148_v40 }
 0x221   :  { %v1150_v45 = vrot.slane %v1149_v42, 2 }
 0x223   :  { %v1151_v48 = vmax.f32 %v1149_v42, %v1150_v45 }
 0x225   :  { %v1152_v50 = vrot.slane %v1151_v48, 1 }
 0x227   :  { %v1153_v53 = vmax.f32 %v1151_v48, %v1152_v50 }
 0x229   :  { %v1192_v55 = vadd.f32 %v1900_v43, %v1153_v53 }
 0x22a   :  { %v1101_v57 = vpop.f32.mrb[12].mxu1 }
 0x22b   :  { %v1200_v59 = vmax.f32 %v1192_v55, 0.0  ;;  %v1103_v60 = vpop.f32.mrb[13].mxu1  ;;  %v1124_v1 = vadd.f32 %v1885_v12, %v1101_v57 }
 0x22c   :  { %v1104_v61 = vpop.f32.mrb[14].mxu1 }
 0x22d   :  { %v1219_v63 = vrot.slane %v1200_v59, 5  ;;  %v1125_v2 = vadd.f32 %v1887_v3, %v1104_v61  ;;  %v1106_v5 = vpop.f32.mrb[15].mxu1 }
 0x22f   :  { %v1175_v7 = vmax.f32 %v1124_v1, %v1125_v2  ;;  %v1221_v8 = vsel %vm1220_vm0, %v1219_v63, %v1218_v15 }
 0x230   :  { %v1224_v9 = vsel %vm1223_vm6, %v1222_v6, %v1221_v8 }
 0x231   :  { %v1176_v11 = vrot.slane %v1175_v7, 4  ;;  %v1227_v4 = vsel %vm1226_vm15, %v1225_v0, %v1224_v9 }
 0x232   :  { %v1230_v13 = vsel %vm1229_vm14, %v1228_v10, %v1227_v4 }
 0x233   :  { %v1177_v14 = vmax.f32 %v1175_v7, %v1176_v11 }
 0x235   :  { %v1178_v16 = vrot.slane %v1177_v14, 2 }
 0x237   :  { %v1179_v17 = vmax.f32 %v1177_v14, %v1178_v16 }
 0x239   :  { %v1180_v18 = vrot.slane %v1179_v17, 1 }
 0x23b   :  { %v1181_v12 = vmax.f32 %v1179_v17, %v1180_v18 }
 0x23d   :  { %v1196_v3 = vadd.f32 %v1900_v43, %v1181_v12 }
 0x23f   :  { %v1204_v19 = vmax.f32 %v1196_v3, 0.0 }
 0x241   :  { %v1231_v20 = vrot.slane %v1204_v19, 1 }
 0x243   :  { %v1233_v15 = vsel %vm1232_vm8, %v1231_v20, %v1230_v13 }
 0x244   :  { %1235 = vst [vmem:[#allocation8] sm:$0xff] %v1233_v15 }
 0x245   :  { %1420 = shalt.err (!%p1417_p0)
}
 0x246   :  { %s1421_s6 = scalar_lea.hbm %s1938_s4, 128 }
 0x247   :  { %p1422_p1 = scmp.ne.s32.totalorder %s1938_s4, %s1421_s6  ;;  %p1425_p2 = scmp.lt.u32.totalorder %s1421_s6, %s1938_s4 }
 0x249   :  { %p1427_p3 = pnand %p1425_p2, %p1422_p1 }
 0x24b   :  { %1430 = shalt.err (!%p1427_p3)
}
 0x24c   :  { %1245 = dma.vmem_to_hbm [thread:$0]  %s1243_s28, 128, %s1938_s4, [#allocation4]  }
 0x24d   :  { %1435 = dma.done.wait [#allocation4], 128  }
 0x24e   :  { %1436 = vsyncadd [#allocation4], 4294967168 }
 0x24f   :  { %1249 = vsyncpa [#allocation3], 1 }
 0x250   :  { %1250 = vsyncpa [#allocation6], 1 }
 0x251   :  { %1251 = vsyncpa [#allocation4], 1 }

</bundles_post_ra>
